<compile_context>
chip_gen: v5e
topology: v5e:2x2
jax: 0.10.0
libtpu: 0.0.40
codegen_flags: <defaults>
</compile_context>

<pallas_src>
import functools

import jax
import jax.numpy as jnp
from jax.experimental import pallas as pl
from jax.experimental.pallas import tpu as pltpu

GAMMA = 2.0                      # default from FocalLoss.__init__
NUM_SPLITS = 2                   # shard the N-reduction across (up to) 2 TCs
VMEM_WORKING_SET_BYTES = 12 << 20   # per-step working-set target (all gens)
VMEM_LIMIT_BYTES = 32 << 20         # scoped-VMEM limit handed to Mosaic
MAX_TN = 4096                       # upper cap on the row tile
OUT_SUB, OUT_LANE = 8, 128          # aligned per-split output block


def _focal_loss_kernel(x_ref, t_ref, o_ref, acc_ref, *, gamma, n,
                       tiles_per_split):
    # x_ref: [TN, C] logits block, t_ref: [TN, 1] int32 targets,
    # o_ref: [8, 128] f32 per-split output block (filled at finalize),
    # acc_ref: [TN, 1] f32 resident per-row accumulator scratch.
    p = pl.program_id(0)          # split (TensorCore shard)
    i = pl.program_id(1)          # row-tile step within the split

    @pl.when(i == 0)
    def _init():
        acc_ref[...] = jnp.zeros_like(acc_ref)

    x = x_ref[...].astype(jnp.float32)                       # [TN, C]
    t = t_ref[...]                                           # [TN, 1] int32
    tn, c = x.shape

    # Numerically stable log-sum-exp along the class (lane) axis. This exp is
    # the only full-tile transcendental in the kernel.
    m = jnp.max(x, axis=1, keepdims=True)                    # [TN, 1]
    z = x - m                                                # [TN, C]
    lse = jnp.log(jnp.sum(jnp.exp(z), axis=1, keepdims=True))  # [TN, 1]

    # Gather the target-class shifted logit via select-then-reduce. (1, C)
    # iota broadcasts against the [TN, 1] targets -> no full-tile iota.
    col = jax.lax.broadcasted_iota(jnp.int32, (1, c), 1)     # [1, C]
    z_t = jnp.sum(jnp.where(col == t, z, 0.0), axis=1, keepdims=True)  # [TN,1]

    # Focal modulation on the picked [TN, 1] values only.
    logpt_t = z_t - lse                                      # [TN, 1]
    pt_t = jnp.exp(logpt_t)                                  # [TN, 1]
    om = jnp.maximum(1.0 - pt_t, 0.0)                        # clamp: pow-safe
    if gamma == 2.0:          # default: one VPU mul instead of exp+log (EUP)
        focal = om * om
    elif gamma == 1.0:
        focal = om
    elif gamma == 0.0:
        focal = jnp.ones_like(om)
    else:
        focal = om ** jnp.float32(gamma)
    mod = focal * logpt_t                                    # [TN, 1]

    # Global row index of this tile. Tiles beyond the real row-tile count
    # (clamped duplicates on the last split) and padded rows of the last
    # partial tile all land at row >= n and are zeroed here.
    tile_idx = p * tiles_per_split + i
    row = tile_idx * tn + jax.lax.broadcasted_iota(jnp.int32, (tn, 1), 0)
    acc_ref[...] += jnp.where(row < n, mod, 0.0)             # [TN, 1]

    @pl.when(i == pl.num_programs(1) - 1)
    def _finalize():
        # Single cross-sublane reduce + negation per split; the partial sum is
        # broadcast into a lane-dense (8, 128) block (wrapper reads [0, 0]).
        total = jnp.sum(acc_ref[...])
        o_ref[...] = jnp.zeros((OUT_SUB, OUT_LANE), jnp.float32) - total


def _round_up(x, m):
    return (x + m - 1) // m * m


def focal_loss(logits, target, gamma=GAMMA, max_block_rows=None):
    """logits: [N, C] float (f32 or bf16), target: [N] int -> scalar f32 loss."""
    n, c = logits.shape
    t2d = target.astype(jnp.int32).reshape(n, 1)

    # Row-tile size: multiple of the sublane tile (8 for 4-byte, 16 for 2-byte
    # dtypes), derived from the VMEM working-set budget as a function of C.
    # Working set per step ~= 2 x double-buffered (tn, C) input block + ~6
    # full-tile f32 temporaries (upcast, z, exp(z), select, ...).
    itemsize = jnp.dtype(logits.dtype).itemsize
    mult = 8 if itemsize >= 4 else 16
    bytes_per_row = c * (2 * itemsize + 6 * 4)
    tn = (VMEM_WORKING_SET_BYTES // bytes_per_row) // mult * mult
    tn = max(mult, min(tn, MAX_TN))
    if max_block_rows is not None:
        tn = max(mult, min(tn, _round_up(max_block_rows, mult)))
    tn = min(tn, _round_up(n, mult))

    num_tiles = pl.cdiv(n, tn)
    num_splits = NUM_SPLITS if num_tiles >= NUM_SPLITS else 1
    tiles_per_split = pl.cdiv(num_tiles, num_splits)

    # Clamp the block index so the (possibly duplicated) last tiles of the
    # final split never DMA past the end of the array; the in-kernel row mask
    # zeroes their contribution.
    def row_tile_map(p, i):
        return (jnp.minimum(p * tiles_per_split + i, num_tiles - 1), 0)

    kernel = functools.partial(_focal_loss_kernel, gamma=float(gamma), n=n,
                               tiles_per_split=tiles_per_split)

    out = pl.pallas_call(
        kernel,
        out_shape=jax.ShapeDtypeStruct((num_splits * OUT_SUB, OUT_LANE),
                                       jnp.float32),
        grid=(num_splits, tiles_per_split),
        in_specs=[
            pl.BlockSpec((tn, c), row_tile_map),
            pl.BlockSpec((tn, 1), row_tile_map),
        ],
        # One aligned (8, 128) output block per split; resident across the
        # "arbitrary" row-tile axis, written back once per split.
        out_specs=pl.BlockSpec((OUT_SUB, OUT_LANE), lambda p, i: (p, 0)),
        scratch_shapes=[pltpu.VMEM((tn, 1), jnp.float32)],
        compiler_params=pltpu.CompilerParams(
            dimension_semantics=("parallel", "arbitrary"),
            vmem_limit_bytes=VMEM_LIMIT_BYTES),
    )(logits, t2d)

    # nll_loss with weight=None, reduction='mean': sum the per-split partials
    # (row 0, lane 0 of each (8,128) block) and divide by N.
    partials = out[::OUT_SUB, 0]
    return jnp.sum(partials) / jnp.float32(n)


def _focal_loss_ref(logits, target, gamma=GAMMA):
    logpt = jax.nn.log_softmax(logits.astype(jnp.float32), axis=1)
    pt = jnp.exp(logpt)
    mod = ((1.0 - pt) ** gamma) * logpt
    picked = jnp.take_along_axis(
        mod, target[:, None].astype(jnp.int32), axis=1)[:, 0]
    return -jnp.mean(picked)


if __name__ == "__main__":
    key = jax.random.PRNGKey(0)
    k1, k2, k3, k4 = jax.random.split(key, 4)

    # Small case consistent with the module's [N, C] / [N] interface.
    N, C = 8, 32
    logits = jax.random.normal(k1, (N, C), dtype=jnp.float32)
    target = jax.random.randint(k2, (N,), 0, C, dtype=jnp.int32)
    loss = jax.block_until_ready(focal_loss(logits, target))
    ref = jax.block_until_ready(_focal_loss_ref(logits, target))
    assert jnp.allclose(loss, ref, atol=1e-5, rtol=1e-5), (loss, ref)

    # Non-default gamma exercises the generic pow path.
    loss_g = jax.block_until_ready(focal_loss(logits, target, gamma=1.5))
    ref_g = jax.block_until_ready(_focal_loss_ref(logits, target, gamma=1.5))
    assert jnp.allclose(loss_g, ref_g, atol=1e-5, rtol=1e-5), (loss_g, ref_g)

    # Multi-tile case with a partial last tile: exercises the grid, the 2-way
    # split (clamped duplicate tile), the resident accumulator and row masking.
    N2, C2 = 300, 128
    logits2 = jax.random.normal(k3, (N2, C2), dtype=jnp.float32)
    target2 = jax.random.randint(k4, (N2,), 0, C2, dtype=jnp.int32)
    loss2 = jax.block_until_ready(focal_loss(logits2, target2,
                                             max_block_rows=128))
    ref2 = jax.block_until_ready(_focal_loss_ref(logits2, target2))
    assert jnp.allclose(loss2, ref2, atol=1e-5, rtol=1e-5), (loss2, ref2)

    # bf16 logits streamed from HBM, upcast to f32 inside the kernel.
    logits3 = logits2.astype(jnp.bfloat16)
    loss3 = jax.block_until_ready(focal_loss(logits3, target2,
                                             max_block_rows=128))
    ref3 = jax.block_until_ready(_focal_loss_ref(logits3, target2))
    assert jnp.allclose(loss3, ref3, atol=1e-4, rtol=1e-4), (loss3, ref3)

    print("KERNEL_OK")
</pallas_src>

<mosaic_0001>
module attributes {stable_mosaic.version = 11 : i64} {
  func.func @_focal_loss_kernel(%arg0: i32, %arg1: i32, %arg2: memref<8x32xf32, #tpu.memory_space<vmem>>, %arg3: memref<8x1xi32, #tpu.memory_space<vmem>>, %arg4: memref<8x128xf32, #tpu.memory_space<vmem>>, %arg5: memref<8x1xf32, #tpu.memory_space<vmem>>) attributes {dimension_semantics = [#tpu.dimension_semantics<parallel>, #tpu.dimension_semantics<arbitrary>], iteration_bounds = array<i64: 1, 1>, scalar_prefetch = 0 : i64, scratch_operands = 1 : i64, tpu.core_type = #tpu.core_type<tc>, window_params = [{transform_indices = @transform_0, window_bounds = array<i64: 8, 32>}, {transform_indices = @transform_1, window_bounds = array<i64: 8, 1>}, {transform_indices = @transform_2, window_bounds = array<i64: 8, 128>}]} {
    %c0_i32 = arith.constant 0 : i32
    %0 = arith.cmpi eq, %arg1, %c0_i32 : i32
    %1 = arith.extui %0 : i1 to i32
    %c0_i32_0 = arith.constant 0 : i32
    %2 = arith.cmpi ne, %1, %c0_i32_0 : i32
    scf.if %2 {
      %cst_17 = arith.constant 0.000000e+00 : f32
      %45 = vector.broadcast %cst_17 : f32 to vector<8x1xf32>
      %c0_18 = arith.constant 0 : index
      %c0_19 = arith.constant 0 : index
      %46 = vector.load %arg5[%c0_18, %c0_19] : memref<8x1xf32, #tpu.memory_space<vmem>>, vector<8x1xf32>
      tpu.vector_store %arg5[%c0_18, %c0_19], %45 {strides = array<i32>} : memref<8x1xf32, #tpu.memory_space<vmem>>, vector<8x1xf32>,
    } else {
    }
    %c0 = arith.constant 0 : index
    %c0_1 = arith.constant 0 : index
    %3 = vector.load %arg2[%c0, %c0_1] : memref<8x32xf32, #tpu.memory_space<vmem>>, vector<8x32xf32>
    %c0_2 = arith.constant 0 : index
    %c0_3 = arith.constant 0 : index
    %4 = vector.load %arg3[%c0_2, %c0_3] : memref<8x1xi32, #tpu.memory_space<vmem>>, vector<8x1xi32>
    %cst = arith.constant dense<0xFF800000> : vector<8xf32>
    %5 = vector.multi_reduction <maximumf>, %3, %cst [1] : vector<8x32xf32> to vector<8xf32>
    %6 = vector.shape_cast %5 : vector<8xf32> to vector<8x1xf32>
    %7 = vector.broadcast %6 : vector<8x1xf32> to vector<8x32xf32>
    %8 = arith.subf %3, %7 : vector<8x32xf32>
    %9 = math.exp %8 : vector<8x32xf32>
    %cst_4 = arith.constant dense<0.000000e+00> : vector<8xf32>
    %10 = vector.multi_reduction <add>, %9, %cst_4 [1] : vector<8x32xf32> to vector<8xf32>
    %11 = vector.shape_cast %10 : vector<8xf32> to vector<8x1xf32>
    %12 = math.log %11 : vector<8x1xf32>
    %13 = tpu.iota {dimensions = array<i32: 1>} : vector<1x32xi32>
    %14 = vector.broadcast %13 : vector<1x32xi32> to vector<8x32xi32>
    %15 = vector.broadcast %4 : vector<8x1xi32> to vector<8x32xi32>
    %16 = arith.cmpi eq, %14, %15 : vector<8x32xi32>
    %cst_5 = arith.constant 0.000000e+00 : f32
    %17 = vector.broadcast %cst_5 : f32 to vector<8x32xf32>
    %18 = arith.select %16, %8, %17 : vector<8x32xi1>, vector<8x32xf32>
    %cst_6 = arith.constant dense<0.000000e+00> : vector<8xf32>
    %19 = vector.multi_reduction <add>, %18, %cst_6 [1] : vector<8x32xf32> to vector<8xf32>
    %20 = vector.shape_cast %19 : vector<8xf32> to vector<8x1xf32>
    %21 = arith.subf %20, %12 : vector<8x1xf32>
    %22 = math.exp %21 : vector<8x1xf32>
    %cst_7 = arith.constant 1.000000e+00 : f32
    %23 = vector.broadcast %cst_7 : f32 to vector<8x1xf32>
    %24 = arith.subf %23, %22 : vector<8x1xf32>
    %cst_8 = arith.constant 0.000000e+00 : f32
    %25 = vector.broadcast %cst_8 : f32 to vector<8x1xf32>
    %26 = arith.maximumf %24, %25 : vector<8x1xf32>
    %27 = arith.mulf %26, %26 : vector<8x1xf32>
    %28 = arith.mulf %27, %21 : vector<8x1xf32>
    %c1_i32 = arith.constant 1 : i32
    %29 = arith.muli %arg0, %c1_i32 : i32
    %30 = arith.addi %29, %arg1 : i32
    %c8_i32 = arith.constant 8 : i32
    %31 = arith.muli %30, %c8_i32 : i32
    %32 = tpu.iota {dimensions = array<i32: 0>} : vector<8x1xi32>
    %33 = vector.broadcast %31 : i32 to vector<8x1xi32>
    %34 = arith.addi %33, %32 : vector<8x1xi32>
    %c0_9 = arith.constant 0 : index
    %c0_10 = arith.constant 0 : index
    %35 = vector.load %arg5[%c0_9, %c0_10] : memref<8x1xf32, #tpu.memory_space<vmem>>, vector<8x1xf32>
    %c8_i32_11 = arith.constant 8 : i32
    %36 = vector.broadcast %c8_i32_11 : i32 to vector<8x1xi32>
    %37 = arith.cmpi slt, %34, %36 : vector<8x1xi32>
    %cst_12 = arith.constant 0.000000e+00 : f32
    %38 = vector.broadcast %cst_12 : f32 to vector<8x1xf32>
    %39 = arith.select %37, %28, %38 : vector<8x1xi1>, vector<8x1xf32>
    %40 = arith.addf %35, %39 : vector<8x1xf32>
    %c0_13 = arith.constant 0 : index
    %c0_14 = arith.constant 0 : index
    %41 = vector.load %arg5[%c0_13, %c0_14] : memref<8x1xf32, #tpu.memory_space<vmem>>, vector<8x1xf32>
    tpu.vector_store %arg5[%c0_13, %c0_14], %40 {strides = array<i32>} : memref<8x1xf32, #tpu.memory_space<vmem>>, vector<8x1xf32>,
    %c0_i32_15 = arith.constant 0 : i32
    %42 = arith.cmpi eq, %arg1, %c0_i32_15 : i32
    %43 = arith.extui %42 : i1 to i32
    %c0_i32_16 = arith.constant 0 : i32
    %44 = arith.cmpi ne, %43, %c0_i32_16 : i32
    scf.if %44 {
      %c0_17 = arith.constant 0 : index
      %c0_18 = arith.constant 0 : index
      %45 = vector.load %arg5[%c0_17, %c0_18] : memref<8x1xf32, #tpu.memory_space<vmem>>, vector<8x1xf32>
      %46 = vector.shape_cast %45 : vector<8x1xf32> to vector<1x8x1xf32>
      %cst_19 = arith.constant dense<0.000000e+00> : vector<1xf32>
      %47 = vector.multi_reduction <add>, %46, %cst_19 [1, 2] : vector<1x8x1xf32> to vector<1xf32>
      %48 = vector.shape_cast %47 : vector<1xf32> to vector<1x1x1xf32>
      %49 = vector.extract %48[0, 0, 0] : f32 from vector<1x1x1xf32>
      %cst_20 = arith.constant 0.000000e+00 : f32
      %50 = vector.broadcast %cst_20 : f32 to vector<8x128xf32>
      %51 = vector.broadcast %49 : f32 to vector<8x128xf32>
      %52 = arith.subf %50, %51 : vector<8x128xf32>
      %c0_21 = arith.constant 0 : index
      %c0_22 = arith.constant 0 : index
      %53 = vector.load %arg4[%c0_21, %c0_22] : memref<8x128xf32, #tpu.memory_space<vmem>>, vector<8x128xf32>
      tpu.vector_store %arg4[%c0_21, %c0_22], %52 {strides = array<i32>} : memref<8x128xf32, #tpu.memory_space<vmem>>, vector<8x128xf32>,
    } else {
    }
    return
  }
  func.func @transform_0(%arg0: i32, %arg1: i32) -> (i32, i32) {
    %c1_i32 = arith.constant 1 : i32
    %0 = arith.muli %arg0, %c1_i32 : i32
    %1 = arith.addi %0, %arg1 : i32
    %c0_i32 = arith.constant 0 : i32
    %2 = arith.minsi %1, %c0_i32 : i32
    %c0_i32_0 = arith.constant 0 : i32
    %c0_i32_1 = arith.constant 0 : i32
    return %2, %c0_i32_0 : i32, i32
  }
  func.func @transform_1(%arg0: i32, %arg1: i32) -> (i32, i32) {
    %c1_i32 = arith.constant 1 : i32
    %0 = arith.muli %arg0, %c1_i32 : i32
    %1 = arith.addi %0, %arg1 : i32
    %c0_i32 = arith.constant 0 : i32
    %2 = arith.minsi %1, %c0_i32 : i32
    %c0_i32_0 = arith.constant 0 : i32
    %c0_i32_1 = arith.constant 0 : i32
    return %2, %c0_i32_0 : i32, i32
  }
  func.func @transform_2(%arg0: i32, %arg1: i32) -> (i32, i32) {
    %c0_i32 = arith.constant 0 : i32
    %c0_i32_0 = arith.constant 0 : i32
    return %arg0, %c0_i32 : i32, i32
  }
}

</mosaic_0001>

<bundles_post_ra>
// kernel: tpu_custom_call.1
= control target key start
LH: loop header
LB: loop body
LE: loop exit
PB: predicated region body
PF: predicated region fallthrough
CT: control target
= control target key end

     0   :  { %vm74_vm0 = vcmask 261120   ;;  %s231_s0 = inlined_call_operand.vmem [shape: f32[8,32], index: 0, kind: input, shape index: {}]   ;;  %s232_s1 = inlined_call_operand.vmem [shape: s32[8,1], index: 1, kind: input, shape index: {}]   ;;  %s233_s2 = inlined_call_operand.hbm [shape: f32[8,128], index: 2, kind: output, shape index: {}]  }
   0x1   :  { %v72_v0 = vld [vmem:[%s231_s0] sm:$0xff] }
   0x2   :  { %7 = vsyncpa [#allocation4], 0  ;;  %v75_v1 = vsel %vm74_vm0, %v72_v0, -inf  ;;  %v198_v2 = vmov 0   ;;  %v73_v3 = vld [vmem:[%s232_s1] sm:$0xff]  ;;  %v86_v9 = vlaneseq  ;;  %vm70_vm2 = vcmask 7168  }
   0x3   :  { %165 = vset.pattern.permute.xlu0 %v198_v2  ;;  %v199_v14 = vmov 0.0   ;;  %s200_s0 = smov [#allocation3]   ;;  %s139_s15 = sshll.u32 %s233_s2, 4  ;;  %s140_s15 = int_to_ptr.hbm [resolvable:$true] %s139_s15 }
   0x4   :  { %76 = vmax.xlane.f32.xlu0 %v75_v1  ;;  %v87_v10 = vand.u32 127, %v86_v9  ;;  %71 = vst.msk [vmem:[#allocation2] sm:$0xff] %vm70_vm2, %v199_v14  ;;  %s137_s1 = sshll.u32 %s200_s0, 4  ;;  %s138_s1 = int_to_ptr.vmem [resolvable:$true] %s137_s1 }
   0xb   :  { %v109_v25 = vld [vmem:[#allocation2] sm:$0xff] }
  0x18   :  { %89 = vperm.xlu0 %165, %v73_v3  }
  0x77   :  { %v77_v4 = vpop.xlane.xlu0 %76 }
  0x78   :  { %v78_v5 = vsub.f32 %v72_v0, %v77_v4 }
  0x7a   :  { %v79_v6 = vmul.f32 1.442695, %v78_v5 }
  0x7c   :  { %166 = vpow2.f32 %v79_v6 }
  0x82   :  { %v167_v7 = vpop.eup %166 }
  0x83   :  { %v81_v8 = vsel %vm74_vm0, %v167_v7, 0.0 }
  0x84   :  { %82 = vadd.xlane.f32.xlu1 %v81_v8 }
  0x8a   :  { %v90_v11 = vpop.permute.xlu0 %89 }
  0x8b   :  { %vm91_vm1 = vcmp.eq.s32.totalorder %v87_v10, %v90_v11 }
  0x8c   :  { %v92_v12 = vsel %vm91_vm1, %v78_v5, 0.0 }
  0x8d   :  { %v93_v13 = vsel %vm74_vm0, %v92_v12, 0.0 }
  0x8e   :  { %94 = vadd.xlane.f32.xlu1 %v93_v13 }
  0xf7   :  { %v83_v15 = vpop.xlane.xlu1 %82 }
  0xf8   :  { %168 = vlog2.f32 %v83_v15 }
  0xfe   :  { %v169_v16 = vpop.eup %168 }
  0xff   :  { %v85_v17 = vmul.f32 0.6931472, %v169_v16 }
 0x101   :  { %v95_v18 = vpop.xlane.xlu1 %94 }
 0x102   :  { %v96_v19 = vsub.f32 %v95_v18, %v85_v17 }
 0x104   :  { %v97_v20 = vmul.f32 1.442695, %v96_v19 }
 0x106   :  { %170 = vpow2.f32 %v97_v20 }
 0x10c   :  { %v171_v21 = vpop.eup %170 }
 0x10d   :  { %v99_v22 = vsub.f32 1.0, %v171_v21 }
 0x10f   :  { %v100_v23 = vmax.f32 %v99_v22, 0.0 }
 0x111   :  { %v101_v24 = vmul.f32 %v100_v23, %v100_v23 }
 0x113   :  { %v102_v26 = vmul.f32 %v101_v24, %v96_v19 }
 0x115   :  { %v112_v27 = vadd.f32 %v109_v25, %v102_v26 }
 0x117   :  { %114 = vst.msk [vmem:[#allocation2] sm:$0xff] %vm70_vm2, %v112_v27 }
 0x11e   :  { %v118_v28 = vld [vmem:[#allocation2] sm:$0xff] }
 0x11f   :  { %v119_v29 = vsel %vm70_vm2, %v118_v28, 0.0 }
 0x120   :  { %120 = vadd.xlane.f32.xlu2 %v119_v29 }
 0x193   :  { %v121_v30 = vpop.xlane.xlu2 %120 }
 0x194   :  { %v122_v31 = vrot.slane %v121_v30, 4 }
 0x196   :  { %v123_v32 = vadd.f32 %v122_v31, %v121_v30 }
 0x198   :  { %v124_v33 = vrot.slane %v123_v32, 2 }
 0x19a   :  { %v125_v34 = vadd.f32 %v124_v33, %v123_v32 }
 0x19c   :  { %v126_v35 = vrot.slane %v125_v34, 1 }
 0x19e   :  { %v127_v36 = vadd.f32 %v126_v35, %v125_v34 }
 0x1a0   :  { %160 = vpush %v127_v36 }
 0x1d1   :  { %s161_s16 = spop %160 }
 0x1d2   :  { %v129_v37 = vstv %s161_s16 }
 0x1d3   :  { %v130_v38 = vsub.f32 0.0, %v129_v37 }
 0x1d5   :  { %131 = vst [vmem:[#allocation3] sm:$0xff] %v130_v38 }
 0x1d6   :  { %142 = dma.vmem_to_hbm [thread:$0]  %s138_s1, 128, %s140_s15, [#allocation4]  }
 0x1d7   :  { %196 = dma.done.wait [#allocation4], 128  }
 0x1d8   :  { %197 = vsyncadd [#allocation4], 4294967168 }
 0x1d9   :  { %147 = vsyncpa [#allocation4], 1 }

</bundles_post_ra>
